<compile_context>
chip_gen: v5e
topology: v5e:2x2
jax: 0.10.0
libtpu: 0.0.40
codegen_flags: <defaults>
</compile_context>

<pallas_src>
import functools

import jax
import jax.numpy as jnp
from jax import lax
from jax.experimental import pallas as pl
from jax.experimental.pallas import tpu as pltpu

_MIB = 1024 * 1024
_SQRT_HALF = 0.70710678118654752440
_SQRT_2_OVER_PI = 0.79788456080286535588


def _gelu_f32(h, approximate):
    if approximate:
        # tanh-approx GELU: transcendental runs on the EUP slot instead of the
        # long f32 erf polynomial on the VALU.  Opt-in (semantic delta ~1e-3
        # vs PyTorch's exact default).
        return 0.5 * h * (1.0 + jnp.tanh(
            jnp.float32(_SQRT_2_OVER_PI) * (h + jnp.float32(0.044715) * h * h * h)))
    # exact GELU (PyTorch F.gelu default): 0.5*x*(1+erf(x/sqrt(2))) in f32
    return 0.5 * h * (1.0 + lax.erf(h * jnp.float32(_SQRT_HALF)))


# --------------------------------------------------------------------------- #
# Kernels
# --------------------------------------------------------------------------- #
def _mlp_tiled_kernel(x_ref, w1_ref, b1_ref, w2_ref, b2_ref, o_ref, acc_ref, *,
                      approximate):
    # x_ref : (TM, d_model)
    # w1_ref: (d_model, TF)     b1_ref: (1, TF)
    # w2_ref: (TF, d_model)     b2_ref: (1, d_model)
    # o_ref : (TM, d_model)     acc_ref: (TM, d_model) f32 scratch
    k = pl.program_id(1)
    x = x_ref[...]

    # linear1 (column slice k of dff): x @ W1[:, k] + b1[k]   (MXU, f32 acc)
    h = jnp.dot(x, w1_ref[...], preferred_element_type=jnp.float32)
    h = _gelu_f32(h + b1_ref[...].astype(jnp.float32), approximate)
    # dropout1: identity (eval mode)

    # linear2 partial sum over this dff tile (cast back so bf16 feeds the MXU).
    partial = jnp.dot(h.astype(x.dtype), w2_ref[...],
                      preferred_element_type=jnp.float32)

    @pl.when(k == 0)
    def _():
        acc_ref[...] = partial          # folded init: no zero-store + RMW pass

    @pl.when(k > 0)
    def _():
        acc_ref[...] = acc_ref[...] + partial

    # dropout2: identity (eval mode)
    @pl.when(k == pl.num_programs(1) - 1)
    def _():
        o_ref[...] = (acc_ref[...]
                      + b2_ref[...].astype(jnp.float32)).astype(o_ref.dtype)


def _mlp_ws_kernel(x_ref, w1_ref, b1_ref, w2_ref, b2_ref, o_ref, *,
                   tf, approximate):
    # Weight-stationary: W1/W2 fully resident in VMEM (loaded once for the
    # whole call); dff reduction is an in-kernel loop over 128-aligned chunks.
    x = x_ref[...]
    dff = w1_ref.shape[1]
    n_chunks = dff // tf

    def chunk(off):
        h = jnp.dot(x, w1_ref[:, pl.ds(off, tf)],
                    preferred_element_type=jnp.float32)
        h = _gelu_f32(h + b1_ref[:, pl.ds(off, tf)].astype(jnp.float32),
                      approximate)
        return jnp.dot(h.astype(x.dtype), w2_ref[pl.ds(off, tf), :],
                       preferred_element_type=jnp.float32)

    acc = chunk(0)
    if n_chunks > 1:
        def body(c, a):
            return a + chunk(pl.multiple_of(c * tf, tf))
        acc = lax.fori_loop(1, n_chunks, body, acc, unroll=(n_chunks <= 8))

    o_ref[...] = (acc + b2_ref[...].astype(jnp.float32)).astype(o_ref.dtype)


# --------------------------------------------------------------------------- #
# Tiling helpers
# --------------------------------------------------------------------------- #
def _round_up(x, m):
    return ((x + m - 1) // m) * m


def _largest_aligned_divisor(full, want, align):
    """Largest t <= want with t % align == 0 and full % t == 0 (None if none)."""
    if full % align != 0:
        return None
    t = min(want, full)
    t = (t // align) * align
    while t >= align:
        if full % t == 0:
            return t
        t -= align
    return None


def _tpu_defaults():
    """Per-generation (tm, tf, vmem_limit, mxu_align) so the weight stream is
    compute-bound: ~tm flops/byte must clear the HBM/MXU roofline."""
    kind = ""
    try:
        kind = jax.devices()[0].device_kind.lower()
    except Exception:
        pass
    if "v7" in kind:
        # 64 MiB VMEM per TensorCore: keep the limit well below physical.
        return "v7", 512, 512, 56 * _MIB, 256
    if "v6" in kind:
        # 128 MiB VMEM: grow tiles so intensity clears ~650 flops/byte.
        return "v6", 1024, 1024, 110 * _MIB, 256
    if "v5" in kind:
        # v5e is compute-bound already at tm=256; MXU is 128-wide.
        return "v5", 256, 512, 64 * _MIB, 128
    return "unknown", 512, 512, 64 * _MIB, 128


def _tiled_vmem_bytes(tm, tf, d_model, x_it, w_it, out_it):
    return (2 * tm * d_model * x_it            # x (double-buffered)
            + 2 * d_model * tf * w_it          # W1 column tile
            + 2 * tf * w_it                    # b1 tile
            + 2 * tf * d_model * w_it          # W2 row tile
            + 2 * d_model * w_it               # b2
            + 2 * tm * d_model * out_it        # out
            + tm * d_model * 4                 # f32 accumulator scratch
            + tm * tf * (4 + x_it))            # h (f32) + cast copy


def _ws_vmem_bytes(tm, dff, tf_ws, d_model, x_it, w_it, out_it):
    return (2 * d_model * dff * w_it           # W1 resident (buffer pair)
            + 2 * dff * w_it                   # b1
            + 2 * dff * d_model * w_it         # W2 resident
            + 2 * d_model * w_it               # b2
            + 2 * tm * d_model * x_it          # x (double-buffered)
            + 2 * tm * d_model * out_it        # out
            + tm * d_model * 4                 # f32 accumulator (loop carry)
            + tm * tf_ws * (4 + x_it))         # per-chunk h (f32) + cast copy


# --------------------------------------------------------------------------- #
# Wrapper
# --------------------------------------------------------------------------- #
def mlp_forward(x, w1, b1, w2, b2, *, tm=None, tf=None, vmem_limit_bytes=None,
                weight_stationary=None, gelu_approximate=False,
                compute_dtype=None):
    """GELU(x @ W1 + b1) @ W2 + b2 with dropout in eval mode (identity).

    x: (B, S, d_model); w1: (d_model, dff); b1: (dff,); w2: (dff, d_model);
    b2: (d_model,).  Set compute_dtype=jnp.bfloat16 to cast x/W1/W2 before the
    kernel (f32 accumulation is kept inside); default keeps caller dtypes.
    """
    B, S, d_model = x.shape
    dff = w1.shape[1]
    M = B * S
    out_dtype = x.dtype

    if compute_dtype is not None:
        x = x.astype(compute_dtype)
        w1 = w1.astype(compute_dtype)
        w2 = w2.astype(compute_dtype)

    x_it = x.dtype.itemsize
    w_it = w1.dtype.itemsize
    out_it = jnp.dtype(out_dtype).itemsize

    gen, tm_req, tf_req, vmem_default, mxu_align = _tpu_defaults()
    if tm is not None:
        tm_req = int(tm)
    if tf is not None:
        tf_req = int(tf)
    if vmem_limit_bytes is None:
        vmem_limit_bytes = vmem_default

    # Sublane alignment for the token tile: 8 rows (f32), 16 (bf16), 32 (8-bit).
    sub_align = {4: 8, 2: 16, 1: 32}.get(x_it, 8)

    # ---- token tile: balanced tiles, MXU-aligned when padding stays small ----
    n_tiles = max(1, -(-M // max(tm_req, sub_align)))
    if gen == "v7" and n_tiles == 1 and M >= 2 * sub_align:
        n_tiles = 2                       # keep both v7x TensorCores busy
    tm_sel = _round_up(-(-M // n_tiles), sub_align)
    tm_mxu = _round_up(tm_sel, mxu_align)
    if n_tiles * tm_mxu - M <= max(M // 8, sub_align):
        tm_sel = tm_mxu                   # MXU-native tile; padding negligible

    # ---- dff tile / padding (lane axis must be 128-aligned or full extent) ----
    if dff % 128 == 0 or dff <= 128:
        dff_p = dff
    else:
        dff_p = _round_up(dff, 128)       # zero cols of W1 / rows of W2 contribute 0
    if dff_p % 128 == 0:
        tf_sel = _largest_aligned_divisor(dff_p, max(128, tf_req), 128)
    else:
        tf_sel = dff_p                    # small dff: single full-extent tile

    # ---- shrink tiles until the tiled-path footprint fits the VMEM budget ----
    budget = int(0.8 * vmem_limit_bytes)
    while _tiled_vmem_bytes(tm_sel, tf_sel, d_model, x_it, w_it, out_it) > budget:
        if tf_sel > 128 and dff_p % 128 == 0:
            cand = _largest_aligned_divisor(dff_p, max(128, tf_sel // 2), 128)
            if cand is not None and cand < tf_sel:
                tf_sel = cand
                continue
        nxt = max(sub_align, (tm_sel // 2 // sub_align) * sub_align)
        if nxt < tm_sel:
            tm_sel = nxt
            continue
        break

    M_pad = _round_up(M, tm_sel)
    num_i = M_pad // tm_sel

    # ---- weight-stationary fast path decision ----
    if dff_p % 128 == 0:
        tf_ws = _largest_aligned_divisor(dff_p, max(128, min(dff_p, 2048)), 128)
    else:
        tf_ws = dff_p
    ws_fits = (_ws_vmem_bytes(tm_sel, dff_p, tf_ws, d_model, x_it, w_it, out_it)
               <= int(0.6 * vmem_limit_bytes))
    use_ws = ws_fits if weight_stationary is None else bool(weight_stationary)

    # ---- pad / reshape operands ----
    x2d = x.reshape(M, d_model)
    if M_pad != M:
        x2d = jnp.pad(x2d, ((0, M_pad - M), (0, 0)))
    if dff_p != dff:
        w1 = jnp.pad(w1, ((0, 0), (0, dff_p - dff)))
        b1 = jnp.pad(b1, ((0, dff_p - dff),))
        w2 = jnp.pad(w2, ((0, dff_p - dff), (0, 0)))
    b1_2d = b1.reshape(1, dff_p)
    b2_2d = b2.reshape(1, d_model)

    # ---- cost estimate with the actual weight re-streaming of this schedule ----
    weight_bytes = (w1.size * w_it + w2.size * w_it
                    + b1_2d.size * b1_2d.dtype.itemsize
                    + b2_2d.size * b2_2d.dtype.itemsize)
    weight_reads = weight_bytes if use_ws else num_i * weight_bytes
    bytes_accessed = x2d.size * x_it + weight_reads + M_pad * d_model * out_it
    cost = pl.CostEstimate(flops=4 * M_pad * d_model * dff_p,
                           transcendentals=M_pad * dff_p,
                           bytes_accessed=int(bytes_accessed))

    if use_ws:
        kernel = functools.partial(_mlp_ws_kernel, tf=tf_ws,
                                   approximate=gelu_approximate)
        grid = (num_i,)
        in_specs = [
            pl.BlockSpec((tm_sel, d_model), lambda i: (i, 0)),   # x tile
            pl.BlockSpec((d_model, dff_p),  lambda i: (0, 0)),   # W1 (resident)
            pl.BlockSpec((1, dff_p),        lambda i: (0, 0)),   # b1
            pl.BlockSpec((dff_p, d_model),  lambda i: (0, 0)),   # W2 (resident)
            pl.BlockSpec((1, d_model),      lambda i: (0, 0)),   # b2
        ]
        out_specs = pl.BlockSpec((tm_sel, d_model), lambda i: (i, 0))
        scratch_shapes = []
        dim_sem = ("parallel",)
    else:
        kernel = functools.partial(_mlp_tiled_kernel,
                                   approximate=gelu_approximate)
        grid = (num_i, dff_p // tf_sel)
        in_specs = [
            pl.BlockSpec((tm_sel, d_model), lambda i, k: (i, 0)),  # x (k-invariant)
            pl.BlockSpec((d_model, tf_sel), lambda i, k: (0, k)),  # W1 column tile
            pl.BlockSpec((1, tf_sel),       lambda i, k: (0, k)),  # b1 tile
            pl.BlockSpec((tf_sel, d_model), lambda i, k: (k, 0)),  # W2 row tile
            pl.BlockSpec((1, d_model),      lambda i, k: (0, 0)),  # b2 (invariant)
        ]
        out_specs = pl.BlockSpec((tm_sel, d_model), lambda i, k: (i, 0))
        scratch_shapes = [pltpu.VMEM((tm_sel, d_model), jnp.float32)]
        dim_sem = ("parallel", "arbitrary")

    out = pl.pallas_call(
        kernel,
        out_shape=jax.ShapeDtypeStruct((M_pad, d_model), out_dtype),
        grid_spec=pltpu.PrefetchScalarGridSpec(
            num_scalar_prefetch=0,
            grid=grid,
            in_specs=in_specs,
            out_specs=out_specs,
            scratch_shapes=scratch_shapes,
        ),
        compiler_params=pltpu.CompilerParams(
            dimension_semantics=dim_sem,
            vmem_limit_bytes=int(vmem_limit_bytes),
        ),
        cost_estimate=cost,
    )(x2d, w1, b1_2d, w2, b2_2d)

    if M_pad != M:
        out = out[:M]
    return out.reshape(B, S, d_model)


def _ref_mlp(x, w1, b1, w2, b2):
    h = jnp.einsum("bsd,df->bsf", x, w1) + b1
    h = jax.nn.gelu(h, approximate=False)
    return jnp.einsum("bsf,fd->bsd", h, w2) + b2


if __name__ == "__main__":
    # Small shapes consistent with the module: batch=2, seq=8, d_model=32, dff=64.
    B, S, d_model, dff = 2, 8, 32, 64

    key = jax.random.PRNGKey(0)
    kx, kw1, kb1, kw2, kb2 = jax.random.split(key, 5)

    x = jax.random.normal(kx, (B, S, d_model), dtype=jnp.float32)

    # Deterministic parameter init (Kaiming-uniform-like bounds from fan_in).
    bound1 = 1.0 / jnp.sqrt(d_model)
    bound2 = 1.0 / jnp.sqrt(dff)
    w1 = jax.random.uniform(kw1, (d_model, dff), jnp.float32, -bound1, bound1)  # = W1.T of torch
    b1 = jax.random.uniform(kb1, (dff,), jnp.float32, -bound1, bound1)
    w2 = jax.random.uniform(kw2, (dff, d_model), jnp.float32, -bound2, bound2)  # = W2.T of torch
    b2 = jax.random.uniform(kb2, (d_model,), jnp.float32, -bound2, bound2)

    y_ref = _ref_mlp(x, w1, b1, w2, b2)

    # Auto path (weight-stationary for these small shapes).
    y_ws = jax.block_until_ready(mlp_forward(x, w1, b1, w2, b2))
    # Force the tiled reduction-over-dff path so both schedules are exercised.
    y_tl = jax.block_until_ready(mlp_forward(x, w1, b1, w2, b2,
                                             weight_stationary=False))

    assert y_ws.shape == (B, S, d_model) and y_tl.shape == (B, S, d_model)
    assert jnp.allclose(y_ws, y_ref, atol=1e-5, rtol=1e-5), "ws path mismatch"
    assert jnp.allclose(y_tl, y_ref, atol=1e-5, rtol=1e-5), "tiled path mismatch"

    print("KERNEL_OK")
</pallas_src>

<mosaic_0001>
module attributes {stable_mosaic.version = 11 : i64} {
  func.func @_mlp_ws_kernel(%arg0: i32, %arg1: memref<16x32xf32, #tpu.memory_space<vmem>>, %arg2: memref<32x64xf32, #tpu.memory_space<vmem>>, %arg3: memref<1x64xf32, #tpu.memory_space<vmem>>, %arg4: memref<64x32xf32, #tpu.memory_space<vmem>>, %arg5: memref<1x32xf32, #tpu.memory_space<vmem>>, %arg6: memref<16x32xf32, #tpu.memory_space<vmem>>) attributes {dimension_semantics = [#tpu.dimension_semantics<parallel>], iteration_bounds = array<i64: 1>, scalar_prefetch = 0 : i64, scratch_operands = 0 : i64, tpu.core_type = #tpu.core_type<tc>, window_params = [{transform_indices = @transform_0, window_bounds = array<i64: 16, 32>}, {pipeline_mode = #tpu.pipeline_mode<synchronous>, transform_indices = @transform_1, window_bounds = array<i64: 32, 64>}, {pipeline_mode = #tpu.pipeline_mode<synchronous>, transform_indices = @transform_2, window_bounds = array<i64: 1, 64>}, {pipeline_mode = #tpu.pipeline_mode<synchronous>, transform_indices = @transform_3, window_bounds = array<i64: 64, 32>}, {pipeline_mode = #tpu.pipeline_mode<synchronous>, transform_indices = @transform_4, window_bounds = array<i64: 1, 32>}, {transform_indices = @transform_5, window_bounds = array<i64: 16, 32>}]} {
    %c0 = arith.constant 0 : index
    %c0_0 = arith.constant 0 : index
    %0 = vector.load %arg1[%c0, %c0_0] : memref<16x32xf32, #tpu.memory_space<vmem>>, vector<16x32xf32>
    %c0_1 = arith.constant 0 : index
    %c0_2 = arith.constant 0 : index
    %1 = vector.load %arg2[%c0_1, %c0_2] : memref<32x64xf32, #tpu.memory_space<vmem>>, vector<32x64xf32>
    %cst = arith.constant dense<0.000000e+00> : vector<16x64xf32>
    %2 = tpu.matmul %0, %1, %cst {dimension_numbers = #tpu.dot_dimension_numbers<[1], [0], [0], [1], [0, 0, 1, 1], [], []>} : vector<16x32xf32>, vector<32x64xf32>, vector<16x64xf32> -> vector<16x64xf32>
    %c0_3 = arith.constant 0 : index
    %c0_4 = arith.constant 0 : index
    %3 = vector.load %arg3[%c0_3, %c0_4] : memref<1x64xf32, #tpu.memory_space<vmem>>, vector<1x64xf32>
    %4 = vector.broadcast %3 : vector<1x64xf32> to vector<16x64xf32>
    %5 = arith.addf %2, %4 : vector<16x64xf32>
    %cst_5 = arith.constant 5.000000e-01 : f32
    %6 = vector.broadcast %cst_5 : f32 to vector<16x64xf32>
    %7 = arith.mulf %6, %5 : vector<16x64xf32>
    %cst_6 = arith.constant 0.707106769 : f32
    %8 = vector.broadcast %cst_6 : f32 to vector<16x64xf32>
    %9 = arith.mulf %5, %8 : vector<16x64xf32>
    %10 = math.erf %9 : vector<16x64xf32>
    %cst_7 = arith.constant 1.000000e+00 : f32
    %11 = vector.broadcast %cst_7 : f32 to vector<16x64xf32>
    %12 = arith.addf %11, %10 : vector<16x64xf32>
    %13 = arith.mulf %7, %12 : vector<16x64xf32>
    %c0_8 = arith.constant 0 : index
    %c0_9 = arith.constant 0 : index
    %14 = vector.load %arg4[%c0_8, %c0_9] : memref<64x32xf32, #tpu.memory_space<vmem>>, vector<64x32xf32>
    %cst_10 = arith.constant dense<0.000000e+00> : vector<16x32xf32>
    %15 = tpu.matmul %13, %14, %cst_10 {dimension_numbers = #tpu.dot_dimension_numbers<[1], [0], [0], [1], [0, 0, 1, 1], [], []>} : vector<16x64xf32>, vector<64x32xf32>, vector<16x32xf32> -> vector<16x32xf32>
    %c0_11 = arith.constant 0 : index
    %c0_12 = arith.constant 0 : index
    %16 = vector.load %arg5[%c0_11, %c0_12] : memref<1x32xf32, #tpu.memory_space<vmem>>, vector<1x32xf32>
    %17 = vector.broadcast %16 : vector<1x32xf32> to vector<16x32xf32>
    %18 = arith.addf %15, %17 : vector<16x32xf32>
    %c0_13 = arith.constant 0 : index
    %c0_14 = arith.constant 0 : index
    %19 = vector.load %arg6[%c0_13, %c0_14] : memref<16x32xf32, #tpu.memory_space<vmem>>, vector<16x32xf32>
    tpu.vector_store %arg6[%c0_13, %c0_14], %18 {strides = array<i32>} : memref<16x32xf32, #tpu.memory_space<vmem>>, vector<16x32xf32>,
    return
  }
  func.func @transform_0(%arg0: i32) -> (i32, i32) {
    %c0_i32 = arith.constant 0 : i32
    %c0_i32_0 = arith.constant 0 : i32
    return %arg0, %c0_i32 : i32, i32
  }
  func.func @transform_1(%arg0: i32) -> (i32, i32) {
    %c0_i32 = arith.constant 0 : i32
    %c0_i32_0 = arith.constant 0 : i32
    %c0_i32_1 = arith.constant 0 : i32
    return %c0_i32, %c0_i32_0 : i32, i32
  }
  func.func @transform_2(%arg0: i32) -> (i32, i32) {
    %c0_i32 = arith.constant 0 : i32
    %c0_i32_0 = arith.constant 0 : i32
    %c0_i32_1 = arith.constant 0 : i32
    return %c0_i32, %c0_i32_0 : i32, i32
  }
  func.func @transform_3(%arg0: i32) -> (i32, i32) {
    %c0_i32 = arith.constant 0 : i32
    %c0_i32_0 = arith.constant 0 : i32
    %c0_i32_1 = arith.constant 0 : i32
    return %c0_i32, %c0_i32_0 : i32, i32
  }
  func.func @transform_4(%arg0: i32) -> (i32, i32) {
    %c0_i32 = arith.constant 0 : i32
    %c0_i32_0 = arith.constant 0 : i32
    %c0_i32_1 = arith.constant 0 : i32
    return %c0_i32, %c0_i32_0 : i32, i32
  }
  func.func @transform_5(%arg0: i32) -> (i32, i32) {
    %c0_i32 = arith.constant 0 : i32
    %c0_i32_0 = arith.constant 0 : i32
    return %arg0, %c0_i32 : i32, i32
  }
}

</mosaic_0001>

<bundles_post_ra>
// kernel: tpu_custom_call.1
= control target key start
LH: loop header
LB: loop body
LE: loop exit
PB: predicated region body
PF: predicated region fallthrough
CT: control target
= control target key end

     0   :  { %s382_s0 = inlined_call_operand.vmem [shape: f32[16,32], index: 0, kind: input, shape index: {}]   ;;  %s383_s1 = inlined_call_operand.vmem [shape: f32[32,64], index: 1, kind: input, shape index: {}]   ;;  %s384_s2 = inlined_call_operand.vmem [shape: f32[1,64], index: 2, kind: input, shape index: {}]   ;;  %s385_s3 = inlined_call_operand.vmem [shape: f32[64,32], index: 3, kind: input, shape index: {}]   ;;  %s386_s4 = inlined_call_operand.vmem [shape: f32[1,32], index: 4, kind: input, shape index: {}]   ;;  %s387_s5 = inlined_call_operand.hbm [shape: f32[16,32], index: 5, kind: output, shape index: {}]  }
   0x1   :  { %v26_v0 = vld [vmem:[%s383_s1 + $0x18] sm:$0xff]  ;;  %v25_v1 = vld [vmem:[%s383_s1 + $0x10] sm:$0xff]  ;;  %v24_v2 = vld [vmem:[%s383_s1 + $0x8] sm:$0xff] }
   0x2   :  { %50 = vmatpush.msra.mxu0 %v26_v0  ;;  %217 = vmatpush.msra.mxu3 %v26_v0 }
   0x4   :  { %51 = vmatpush.msra.mxu0 %v25_v1  ;;  %218 = vmatpush.msra.mxu3 %v25_v1 }
   0x5   :  { %10 = vsyncpa [#allocation3], 0  ;;  %v23_v3 = vld [vmem:[%s383_s1] sm:$0xff]  ;;  %vm31_vm0 = vcmask 261120   ;;  %v22_v5 = vld [vmem:[%s382_s0 + $0x8] sm:$0xff]  ;;  %vm161_vm9 = vcmask 523264  }
   0x6   :  { %52 = vmatpush.msra.mxu0 %v24_v2  ;;  %219 = vmatpush.msra.mxu3 %v24_v2  ;;  %v21_v4 = vld [vmem:[%s382_s0] sm:$0xff]  ;;  %v156_v14 = vld [vmem:[%s385_s3 + $0x38] sm:$0xff]  ;;  %v155_v18 = vld [vmem:[%s385_s3 + $0x30] sm:$0xff]  ;;  %s264_s21 = smov [#allocation2]   ;;  %s199_s25 = sshll.u32 %s387_s5, 4  ;;  %s200_s25 = int_to_ptr.hbm [resolvable:$true] %s199_s25 }
   0x7   :  { %v232_v6 = vld [vmem:[%s384_s2] ss:$0 sm:$0xff]  ;;  %176 = vmatpush.msra.mxu1 %v156_v14  ;;  %221 = vmatpush.msra.mxu2 %v156_v14  ;;  %v154_v22 = vld [vmem:[%s385_s3 + $0x28] sm:$0xff]  ;;  %v152_v31 = vld [vmem:[%s385_s3 + $0x18] sm:$0xff]  ;;  %s197_s22 = sshll.u32 %s264_s21, 4  ;;  %s265_s26 = smov 128   ;;  %s198_s22 = int_to_ptr.vmem [resolvable:$true] %s197_s22 }
   0x8   :  { %53 = vmatpush.msra.mxu0 %v23_v3  ;;  %220 = vmatpush.msra.mxu3 %v23_v3  ;;  %v153_v26 = vld [vmem:[%s385_s3 + $0x20] sm:$0xff]  ;;  %v151_v35 = vld [vmem:[%s385_s3 + $0x10] sm:$0xff]  ;;  %v150_v40 = vld [vmem:[%s385_s3 + $0x8] sm:$0xff]  ;;  %s266_s27 = smov 8  }
   0x9   :  { %211 = vmatmul.msk.f32.vlgmr.msra.gmra.mxu0 %vm31_vm0, %v21_v4  ;;  %212 = vmatmul.msk.f32.vlgmr.msra.gmra.mxu3 %vm31_vm0, %v22_v5  ;;  %v149_v42 = vld [vmem:[%s385_s3] sm:$0xff] }
   0xa   :  { %177 = vmatpush.msra.mxu1 %v155_v18  ;;  %222 = vmatpush.msra.mxu2 %v155_v18 }
   0xc   :  { %178 = vmatpush.msra.mxu1 %v154_v22  ;;  %223 = vmatpush.msra.mxu2 %v154_v22 }
   0xe   :  { %179 = vmatpush.msra.mxu1 %v153_v26  ;;  %224 = vmatpush.msra.mxu2 %v153_v26 }
  0x10   :  { %180 = vmatpush.msra.mxu1 %v152_v31  ;;  %225 = vmatpush.msra.mxu2 %v152_v31 }
  0x12   :  { %181 = vmatpush.msra.mxu1 %v151_v35  ;;  %226 = vmatpush.msra.mxu2 %v151_v35 }
  0x14   :  { %182 = vmatpush.msra.mxu1 %v150_v40  ;;  %227 = vmatpush.msra.mxu2 %v150_v40 }
  0x16   :  { %183 = vmatpush.msra.mxu1 %v149_v42  ;;  %228 = vmatpush.msra.mxu2 %v149_v42 }
  0x86   :  { %v55_v7 = vpop.f32.mrf.mxu0 }
  0x87   :  { %v320_v8 = vadd.f32 %v232_v6, %v55_v7 }
  0x89   :  { %v323_v9 = vmul.f32 0.70710677, %v320_v8  ;;  %v61_v26 = vmul.f32 0.5, %v320_v8  ;;  %v233_v8 = vld [vmem:[%s386_s4] ss:$0 sm:$0xff] }
  0x8b   :  { %v65_v10 = vmul.f32 %v323_v9, %v323_v9 }
  0x8c   :  { %v58_v11 = vpop.f32.mrf.mxu3 }
  0x8d   :  { %v327_v12 = vmin.f32 %v65_v10, 16.0  ;;  %v329_v13 = vadd.f32 %v232_v6, %v58_v11 }
  0x8f   :  { %v67_v15 = vmul.f32 2.1237322e-06, %v327_v12  ;;  %v78_v16 = vmul.f32 3.8918573e-05, %v327_v12  ;;  %v337_v17 = vmul.f32 0.70710677, %v329_v13 }
  0x91   :  { %v68_v19 = vadd.f32 0.00028619796, %v67_v15  ;;  %v79_v20 = vadd.f32 0.001143296, %v78_v16  ;;  %v105_v21 = vmul.f32 %v337_v17, %v337_v17 }
  0x93   :  { %v69_v23 = vmul.f32 %v68_v19, %v327_v12  ;;  %v80_v24 = vmul.f32 %v79_v20, %v327_v12  ;;  %v106_v25 = vmin.f32 %v105_v21, 16.0 }
  0x95   :  { %v70_v27 = vadd.f32 0.0036580483, %v69_v23  ;;  %v81_v28 = vadd.f32 0.014752088, %v80_v24  ;;  %v107_v29 = vmul.f32 2.1237322e-06, %v106_v25 }
  0x96   :  { %v118_v30 = vmul.f32 3.8918573e-05, %v106_v25 }
  0x97   :  { %v82_v32 = vmul.f32 %v81_v28, %v327_v12  ;;  %v108_v33 = vadd.f32 0.00028619796, %v107_v29  ;;  %v71_v37 = vmul.f32 %v70_v27, %v327_v12 }
  0x98   :  { %v119_v34 = vadd.f32 0.001143296, %v118_v30 }
  0x99   :  { %v83_v36 = vadd.f32 0.112945676, %v82_v32  ;;  %v109_v38 = vmul.f32 %v108_v33, %v106_v25  ;;  %v72_v46 = vadd.f32 0.05243302, %v71_v37  ;;  %v62_v33 = vmul.f32 0.5, %v329_v13 }
  0x9a   :  { %v120_v39 = vmul.f32 %v119_v34, %v106_v25 }
  0x9b   :  { %v84_v41 = vmul.f32 %v83_v36, %v327_v12  ;;  %v110_v45 = vadd.f32 0.0036580483, %v109_v38  ;;  %v73_v52 = vmul.f32 %v72_v46, %v327_v12 }
  0x9c   :  { %v121_v43 = vadd.f32 0.014752088, %v120_v39 }
  0x9d   :  { %v85_v44 = vadd.f32 0.4994258, %v84_v41  ;;  %v111_v51 = vmul.f32 %v110_v45, %v106_v25  ;;  %v74_v56 = vadd.f32 0.18741608, %v73_v52 }
  0x9e   :  { %v122_v47 = vmul.f32 %v121_v43, %v106_v25 }
  0x9f   :  { %v86_v48 = vmul.f32 %v85_v44, %v327_v12  ;;  %v112_v55 = vadd.f32 0.05243302, %v111_v51  ;;  %v75_v61 = vmul.f32 %v74_v56, %v327_v12 }
  0xa0   :  { %v123_v49 = vadd.f32 0.112945676, %v122_v47 }
  0xa1   :  { %v87_v50 = vadd.f32 1.0, %v86_v48  ;;  %v113_v60 = vmul.f32 %v112_v55, %v106_v25  ;;  %v76_v2 = vadd.f32 1.1283791, %v75_v61 }
  0xa2   :  { %v124_v53 = vmul.f32 %v123_v49, %v106_v25 }
  0xa3   :  { %234 = vrcp.f32 %v87_v50  ;;  %v99_v0 = vand.u32 2147483648, %v87_v50  ;;  %v114_v1 = vadd.f32 0.18741608, %v113_v60  ;;  %v97_v4 = vand.u32 2147483647, %v87_v50 }
  0xa4   :  { %v125_v54 = vadd.f32 0.4994258, %v124_v53  ;;  %vm93_vm2 = vweird.f32 %v87_v50  ;;  %v77_v14 = vmul.f32 %v76_v2, %v323_v9 }
  0xa5   :  { %v100_v7 = vor.u32 1.1754944e-38, %v99_v0  ;;  %v115_v10 = vmul.f32 %v114_v1, %v106_v25  ;;  %vm98_vm4 = vcmp.eq.f32.partialorder %v97_v4, 8.507059e+37 }
  0xa6   :  { %v126_v57 = vmul.f32 %v125_v54, %v106_v25 }
  0xa7   :  { %v116_v20 = vadd.f32 1.1283791, %v115_v10 }
  0xa8   :  { %v127_v58 = vadd.f32 1.0, %v126_v57 }
  0xa9   :  { %v235_v59 = vpop.eup %234  ;;  %v117_v9 = vmul.f32 %v116_v20, %v337_v17 }
  0xaa   :  { %v89_v62 = vmul.f32 %v235_v59, %v87_v50  ;;  %236 = vrcp.f32 %v127_v58  ;;  %vm94_vm1 = vweird.f32 %v235_v59  ;;  %v139_v19 = vand.u32 2147483648, %v127_v58 }
  0xab   :  { %vm95_vm3 = vmor %vm93_vm2, %vm94_vm1  ;;  %v137_v22 = vand.u32 2147483647, %v127_v58  ;;  %vm133_vm6 = vweird.f32 %v127_v58 }
  0xac   :  { %v90_v63 = vsub.f32 1.0, %v89_v62  ;;  %v140_v25 = vor.u32 1.1754944e-38, %v139_v19 }
  0xad   :  { %vm138_vm8 = vcmp.eq.f32.partialorder %v137_v22, 8.507059e+37 }
  0xae   :  { %v91_v3 = vmul.f32 %v235_v59, %v90_v63 }
  0xb0   :  { %v237_v5 = vpop.eup %236  ;;  %v92_v6 = vadd.f32 %v235_v59, %v91_v3 }
  0xb1   :  { %v129_v11 = vmul.f32 %v237_v5, %v127_v58  ;;  %vm134_vm5 = vweird.f32 %v237_v5 }
  0xb2   :  { %v96_v15 = vsel %vm95_vm3, %v235_v59, %v92_v6  ;;  %vm135_vm7 = vmor %vm133_vm6, %vm134_vm5 }
  0xb3   :  { %v101_v12 = vsel %vm98_vm4, %v100_v7, %v96_v15  ;;  %v130_v16 = vsub.f32 1.0, %v129_v11 }
  0xb4   :  { %v102_v18 = vmul.f32 %v101_v12, %v77_v14 }
  0xb5   :  { %v131_v21 = vmul.f32 %v237_v5, %v130_v16 }
  0xb6   :  { %v213_v23 = vclamps-f32 %v102_v18, 1.0 }
  0xb7   :  { %v132_v24 = vadd.f32 %v237_v5, %v131_v21 }
  0xb8   :  { %v145_v27 = vadd.f32 1.0, %v213_v23 }
  0xb9   :  { %v136_v28 = vsel %vm135_vm7, %v237_v5, %v132_v24 }
  0xba   :  { %v141_v29 = vsel %vm138_vm8, %v140_v25, %v136_v28  ;;  %v147_v30 = vmul.f32 %v145_v27, %v61_v26 }
  0xbb   :  { %v142_v31 = vmul.f32 %v141_v29, %v117_v9 }
  0xbc   :  { %215 = vmatmul.msk.f32.vlgmr.msra.gmra.mxu1 %vm161_vm9, %v147_v30 }
  0xbd   :  { %v214_v32 = vclamps-f32 %v142_v31, 1.0 }
  0xbf   :  { %v146_v34 = vadd.f32 1.0, %v214_v32 }
  0xc1   :  { %v148_v35 = vmul.f32 %v146_v34, %v62_v33 }
  0xc3   :  { %216 = vmatmul.msk.f32.vlgmr.msra.gmra.mxu2 %vm161_vm9, %v148_v35 }
 0x139   :  { %v185_v36 = vpop.f32.mrf.mxu1 }
 0x13a   :  { %v186_v37 = vadd.f32 %v233_v8, %v185_v36 }
 0x13c   :  { %191 = vst.msk [vmem:[#allocation2] sm:$0xff] %vm31_vm0, %v186_v37 }
 0x146   :  { %v188_v17 = vpop.f32.mrf.mxu2 }
 0x147   :  { %v189_v13 = vadd.f32 %v233_v8, %v188_v17 }
 0x149   :  { %192 = vst.msk [vmem:[#allocation2 + $0x8] sm:$0xff] %vm31_vm0, %v189_v13 }
 0x14a   :  { %205 = dma.vmem_to_hbm [thread:$0]  %s198_s22, 256, %s200_s25, [#allocation3], %s265_s26, %s265_s26, %s266_s27  }
 0x14b   :  { %262 = dma.done.wait [#allocation3], 256  }
 0x14c   :  { %263 = vsyncadd [#allocation3], 4294967040 }
 0x14d   :  { %210 = vsyncpa [#allocation3], 1 }

</bundles_post_ra>
